<compile_context>
chip_gen: v7x
topology: tpu7x:2x2x1
jax: 0.10.0
libtpu: 0.0.40
codegen_flags: <defaults>
</compile_context>

<pallas_src>
import jax
import jax.numpy as jnp
from jax.experimental import pallas as pl
from jax.experimental.pallas import tpu as pltpu

LANES = 128          # lane width of a vreg
MAX_TILE_ROWS = 512  # (512, 128) f32 = 256 KiB per buffer; ~1 MiB double-buffered


def mlp_kernel(w1_ref, b1_ref, w2_ref, b2_ref, x_ref, o_ref):
    # x tile: (tile_rows, 128) f32, batch on the lane axis.
    x = x_ref[...]
    acc = jnp.zeros_like(x)
    # Hidden width is 6: fully unrolled VPU broadcast multiply-adds.
    #   h_j = relu(x * W1[j] + b1[j]);  y = relu(sum_j h_j * W2[j] + b2)
    for j in range(6):
        h = jnp.maximum(x * w1_ref[j] + b1_ref[j], 0.0)
        acc = acc + h * w2_ref[j]
    o_ref[...] = jnp.maximum(acc + b2_ref[0], 0.0)


def mlp_forward(x, w1, b1, w2, b2):
    """x: (B, 1) f32.  w1,b1,w2: (6,) f32.  b2: (1,) f32.  Returns (B, 1)."""
    B = x.shape[0]
    dtype = x.dtype

    rows = -(-B // LANES)                       # ceil(B / 128)
    if rows <= MAX_TILE_ROWS:
        tile_rows = -(-rows // 8) * 8           # single tile, sublane-aligned
    else:
        tile_rows = MAX_TILE_ROWS
    rows_padded = -(-rows // tile_rows) * tile_rows
    b_pad = rows_padded * LANES

    x_flat = jnp.ravel(x)
    if b_pad != B:
        x_flat = jnp.pad(x_flat, (0, b_pad - B))
    x2d = x_flat.reshape(rows_padded, LANES)    # lane-dense: batch on lanes

    smem = pl.BlockSpec(memory_space=pltpu.MemorySpace.SMEM)
    tile_spec = pl.BlockSpec((tile_rows, LANES), lambda i: (i, 0))

    out2d = pl.pallas_call(
        mlp_kernel,
        out_shape=jax.ShapeDtypeStruct((rows_padded, LANES), dtype),
        grid=(rows_padded // tile_rows,),
        in_specs=[smem, smem, smem, smem, tile_spec],
        out_specs=tile_spec,
        compiler_params=pltpu.CompilerParams(
            dimension_semantics=("parallel",)),
    )(w1, b1, w2, b2, x2d)

    return out2d.reshape(-1)[:B].reshape(B, 1)


def init_params(key):
    # Mimics torch.nn.Linear's uniform(-1/sqrt(fan_in), 1/sqrt(fan_in)).
    k1, k2, k3, k4 = jax.random.split(key, 4)
    bound1 = 1.0                      # fan_in = 1
    w1 = jax.random.uniform(k1, (6,), jnp.float32, -bound1, bound1)  # L1 weight (6,1) flattened
    b1 = jax.random.uniform(k2, (6,), jnp.float32, -bound1, bound1)  # L1 bias
    bound2 = 1.0 / jnp.sqrt(6.0)      # fan_in = 6
    w2 = jax.random.uniform(k3, (6,), jnp.float32, -bound2, bound2)  # L2 weight (1,6) flattened
    b2 = jax.random.uniform(k4, (1,), jnp.float32, -bound2, bound2)  # L2 bias
    return w1, b1, w2, b2


if __name__ == "__main__":
    key = jax.random.PRNGKey(0)
    kx, kp = jax.random.split(key)
    B = 300  # not a multiple of 128 -> exercises pad + slice path
    x = jax.random.normal(kx, (B, 1), jnp.float32)
    w1, b1, w2, b2 = init_params(kp)

    out = mlp_forward(x, w1, b1, w2, b2)
    out = jax.block_until_ready(out)

    # Plain-JAX reference (same math as the PyTorch forward).
    ref = jnp.maximum(
        jnp.maximum(x @ w1.reshape(1, 6) + b1.reshape(1, 6), 0.0)
        @ w2.reshape(6, 1) + b2.reshape(1, 1),
        0.0,
    )
    assert out.shape == (B, 1)
    assert jnp.allclose(out, ref, atol=1e-5, rtol=1e-5)

    print("KERNEL_OK")
</pallas_src>

<mosaic_0001>
module attributes {stable_mosaic.version = 11 : i64} {
  func.func @mlp_kernel(%arg0: i32, %arg1: memref<6xf32, #tpu.memory_space<smem>>, %arg2: memref<6xf32, #tpu.memory_space<smem>>, %arg3: memref<6xf32, #tpu.memory_space<smem>>, %arg4: memref<1xf32, #tpu.memory_space<smem>>, %arg5: memref<8x128xf32, #tpu.memory_space<vmem>>, %arg6: memref<8x128xf32, #tpu.memory_space<vmem>>) attributes {dimension_semantics = [#tpu.dimension_semantics<parallel>], iteration_bounds = array<i64: 1>, scalar_prefetch = 0 : i64, scratch_operands = 0 : i64, tpu.core_type = #tpu.core_type<tc>, window_params = [{transform_indices = @transform_0, window_bounds = array<i64: 6>}, {transform_indices = @transform_1, window_bounds = array<i64: 6>}, {transform_indices = @transform_2, window_bounds = array<i64: 6>}, {transform_indices = @transform_3, window_bounds = array<i64: 1>}, {transform_indices = @transform_4, window_bounds = array<i64: 8, 128>}, {transform_indices = @transform_5, window_bounds = array<i64: 8, 128>}]} {
    %c0 = arith.constant 0 : index
    %c0_0 = arith.constant 0 : index
    %0 = vector.load %arg5[%c0, %c0_0] : memref<8x128xf32, #tpu.memory_space<vmem>>, vector<8x128xf32>
    %cst = arith.constant 0.000000e+00 : f32
    %1 = vector.broadcast %cst : f32 to vector<8x128xf32>
    %c0_1 = arith.constant 0 : index
    %2 = memref.load %arg1[%c0_1] : memref<6xf32, #tpu.memory_space<smem>>
    %3 = vector.broadcast %2 : f32 to vector<8x128xf32>
    %4 = arith.mulf %0, %3 : vector<8x128xf32>
    %c0_2 = arith.constant 0 : index
    %5 = memref.load %arg2[%c0_2] : memref<6xf32, #tpu.memory_space<smem>>
    %6 = vector.broadcast %5 : f32 to vector<8x128xf32>
    %7 = arith.addf %4, %6 : vector<8x128xf32>
    %cst_3 = arith.constant 0.000000e+00 : f32
    %8 = vector.broadcast %cst_3 : f32 to vector<8x128xf32>
    %9 = arith.maximumf %7, %8 : vector<8x128xf32>
    %c0_4 = arith.constant 0 : index
    %10 = memref.load %arg3[%c0_4] : memref<6xf32, #tpu.memory_space<smem>>
    %11 = vector.broadcast %10 : f32 to vector<8x128xf32>
    %12 = arith.mulf %9, %11 : vector<8x128xf32>
    %13 = arith.addf %1, %12 : vector<8x128xf32>
    %c1 = arith.constant 1 : index
    %14 = memref.load %arg1[%c1] : memref<6xf32, #tpu.memory_space<smem>>
    %15 = vector.broadcast %14 : f32 to vector<8x128xf32>
    %16 = arith.mulf %0, %15 : vector<8x128xf32>
    %c1_5 = arith.constant 1 : index
    %17 = memref.load %arg2[%c1_5] : memref<6xf32, #tpu.memory_space<smem>>
    %18 = vector.broadcast %17 : f32 to vector<8x128xf32>
    %19 = arith.addf %16, %18 : vector<8x128xf32>
    %cst_6 = arith.constant 0.000000e+00 : f32
    %20 = vector.broadcast %cst_6 : f32 to vector<8x128xf32>
    %21 = arith.maximumf %19, %20 : vector<8x128xf32>
    %c1_7 = arith.constant 1 : index
    %22 = memref.load %arg3[%c1_7] : memref<6xf32, #tpu.memory_space<smem>>
    %23 = vector.broadcast %22 : f32 to vector<8x128xf32>
    %24 = arith.mulf %21, %23 : vector<8x128xf32>
    %25 = arith.addf %13, %24 : vector<8x128xf32>
    %c2 = arith.constant 2 : index
    %26 = memref.load %arg1[%c2] : memref<6xf32, #tpu.memory_space<smem>>
    %27 = vector.broadcast %26 : f32 to vector<8x128xf32>
    %28 = arith.mulf %0, %27 : vector<8x128xf32>
    %c2_8 = arith.constant 2 : index
    %29 = memref.load %arg2[%c2_8] : memref<6xf32, #tpu.memory_space<smem>>
    %30 = vector.broadcast %29 : f32 to vector<8x128xf32>
    %31 = arith.addf %28, %30 : vector<8x128xf32>
    %cst_9 = arith.constant 0.000000e+00 : f32
    %32 = vector.broadcast %cst_9 : f32 to vector<8x128xf32>
    %33 = arith.maximumf %31, %32 : vector<8x128xf32>
    %c2_10 = arith.constant 2 : index
    %34 = memref.load %arg3[%c2_10] : memref<6xf32, #tpu.memory_space<smem>>
    %35 = vector.broadcast %34 : f32 to vector<8x128xf32>
    %36 = arith.mulf %33, %35 : vector<8x128xf32>
    %37 = arith.addf %25, %36 : vector<8x128xf32>
    %c3 = arith.constant 3 : index
    %38 = memref.load %arg1[%c3] : memref<6xf32, #tpu.memory_space<smem>>
    %39 = vector.broadcast %38 : f32 to vector<8x128xf32>
    %40 = arith.mulf %0, %39 : vector<8x128xf32>
    %c3_11 = arith.constant 3 : index
    %41 = memref.load %arg2[%c3_11] : memref<6xf32, #tpu.memory_space<smem>>
    %42 = vector.broadcast %41 : f32 to vector<8x128xf32>
    %43 = arith.addf %40, %42 : vector<8x128xf32>
    %cst_12 = arith.constant 0.000000e+00 : f32
    %44 = vector.broadcast %cst_12 : f32 to vector<8x128xf32>
    %45 = arith.maximumf %43, %44 : vector<8x128xf32>
    %c3_13 = arith.constant 3 : index
    %46 = memref.load %arg3[%c3_13] : memref<6xf32, #tpu.memory_space<smem>>
    %47 = vector.broadcast %46 : f32 to vector<8x128xf32>
    %48 = arith.mulf %45, %47 : vector<8x128xf32>
    %49 = arith.addf %37, %48 : vector<8x128xf32>
    %c4 = arith.constant 4 : index
    %50 = memref.load %arg1[%c4] : memref<6xf32, #tpu.memory_space<smem>>
    %51 = vector.broadcast %50 : f32 to vector<8x128xf32>
    %52 = arith.mulf %0, %51 : vector<8x128xf32>
    %c4_14 = arith.constant 4 : index
    %53 = memref.load %arg2[%c4_14] : memref<6xf32, #tpu.memory_space<smem>>
    %54 = vector.broadcast %53 : f32 to vector<8x128xf32>
    %55 = arith.addf %52, %54 : vector<8x128xf32>
    %cst_15 = arith.constant 0.000000e+00 : f32
    %56 = vector.broadcast %cst_15 : f32 to vector<8x128xf32>
    %57 = arith.maximumf %55, %56 : vector<8x128xf32>
    %c4_16 = arith.constant 4 : index
    %58 = memref.load %arg3[%c4_16] : memref<6xf32, #tpu.memory_space<smem>>
    %59 = vector.broadcast %58 : f32 to vector<8x128xf32>
    %60 = arith.mulf %57, %59 : vector<8x128xf32>
    %61 = arith.addf %49, %60 : vector<8x128xf32>
    %c5 = arith.constant 5 : index
    %62 = memref.load %arg1[%c5] : memref<6xf32, #tpu.memory_space<smem>>
    %63 = vector.broadcast %62 : f32 to vector<8x128xf32>
    %64 = arith.mulf %0, %63 : vector<8x128xf32>
    %c5_17 = arith.constant 5 : index
    %65 = memref.load %arg2[%c5_17] : memref<6xf32, #tpu.memory_space<smem>>
    %66 = vector.broadcast %65 : f32 to vector<8x128xf32>
    %67 = arith.addf %64, %66 : vector<8x128xf32>
    %cst_18 = arith.constant 0.000000e+00 : f32
    %68 = vector.broadcast %cst_18 : f32 to vector<8x128xf32>
    %69 = arith.maximumf %67, %68 : vector<8x128xf32>
    %c5_19 = arith.constant 5 : index
    %70 = memref.load %arg3[%c5_19] : memref<6xf32, #tpu.memory_space<smem>>
    %71 = vector.broadcast %70 : f32 to vector<8x128xf32>
    %72 = arith.mulf %69, %71 : vector<8x128xf32>
    %73 = arith.addf %61, %72 : vector<8x128xf32>
    %c0_20 = arith.constant 0 : index
    %74 = memref.load %arg4[%c0_20] : memref<1xf32, #tpu.memory_space<smem>>
    %75 = vector.broadcast %74 : f32 to vector<8x128xf32>
    %76 = arith.addf %73, %75 : vector<8x128xf32>
    %cst_21 = arith.constant 0.000000e+00 : f32
    %77 = vector.broadcast %cst_21 : f32 to vector<8x128xf32>
    %78 = arith.maximumf %76, %77 : vector<8x128xf32>
    %c0_22 = arith.constant 0 : index
    %c0_23 = arith.constant 0 : index
    %79 = vector.load %arg6[%c0_22, %c0_23] : memref<8x128xf32, #tpu.memory_space<vmem>>, vector<8x128xf32>
    tpu.vector_store %arg6[%c0_22, %c0_23], %78 {strides = array<i32>} : memref<8x128xf32, #tpu.memory_space<vmem>>, vector<8x128xf32>,
    return
  }
  func.func @transform_0(%arg0: i32) -> i32 {
    %c0_i32 = arith.constant 0 : i32
    %c0_i32_0 = arith.constant 0 : i32
    return %c0_i32 : i32
  }
  func.func @transform_1(%arg0: i32) -> i32 {
    %c0_i32 = arith.constant 0 : i32
    %c0_i32_0 = arith.constant 0 : i32
    return %c0_i32 : i32
  }
  func.func @transform_2(%arg0: i32) -> i32 {
    %c0_i32 = arith.constant 0 : i32
    %c0_i32_0 = arith.constant 0 : i32
    return %c0_i32 : i32
  }
  func.func @transform_3(%arg0: i32) -> i32 {
    %c0_i32 = arith.constant 0 : i32
    %c0_i32_0 = arith.constant 0 : i32
    return %c0_i32 : i32
  }
  func.func @transform_4(%arg0: i32) -> (i32, i32) {
    %c0_i32 = arith.constant 0 : i32
    %c0_i32_0 = arith.constant 0 : i32
    return %arg0, %c0_i32 : i32, i32
  }
  func.func @transform_5(%arg0: i32) -> (i32, i32) {
    %c0_i32 = arith.constant 0 : i32
    %c0_i32_0 = arith.constant 0 : i32
    return %arg0, %c0_i32 : i32, i32
  }
}

</mosaic_0001>

<bundles_post_ra>
// kernel: tpu_custom_call.1
= control target key start
LH: loop header
LB: loop body
LE: loop exit
PB: predicated region body
PF: predicated region fallthrough
CT: control target
= control target key end

     0   :  { %11 = vsyncpa [#allocation5], 0  ;;  %s323_s0 = inlined_call_operand.vmem [shape: f32[6], index: 0, kind: input, shape index: {}]   ;;  %s324_s1 = inlined_call_operand.vmem [shape: f32[6], index: 1, kind: input, shape index: {}]   ;;  %s325_s2 = inlined_call_operand.vmem [shape: f32[6], index: 2, kind: input, shape index: {}]   ;;  %s326_s3 = inlined_call_operand.<no memory space> [shape: f32[1], index: 3, kind: input, shape index: {}]   ;;  %s327_s4 = inlined_call_operand.vmem [shape: f32[8,128], index: 4, kind: input, shape index: {}]   ;;  %s328_s5 = inlined_call_operand.hbm [shape: f32[8,128], index: 5, kind: output, shape index: {}]  }
   0x1   :  { %12 = vsyncpa [#allocation7], 0  ;;  %s30_s20 = sshll.u32 %s324_s1, 4  ;;  %s31_s20 = int_to_ptr.vmem [resolvable:$true] %s30_s20 }
   0x2   :  { %13 = vsyncpa [#allocation4], 0  ;;  %s20_s23 = sshll.u32 %s323_s0, 4  ;;  %s165_s24 = scalar_lea.vmem %s31_s20, 16  ;;  %s21_s23 = int_to_ptr.vmem [resolvable:$true] %s20_s23 }
   0x3   :  { %p166_p0 = scmp.ne.s32.totalorder %s31_s20, %s165_s24  ;;  %p170_p1 = scmp.lt.s32.totalorder %s31_s20, %s31_s20 }
   0x4   :  { %p171_p2 = scmp.lt.s32.totalorder %s165_s24, %s165_s24 }
   0x6   :  { %p172_p3 = por %p171_p2, %p170_p1 }
   0x8   :  { %p173_p4 = pnand %p172_p3, %p166_p0 }
   0xa   :  { %176 = shalt.err (!%p173_p4)
}
   0xb   :  { %s229_s25 = smov [#allocation6]   ;;  %s177_s26 = scalar_lea.vmem %s21_s23, 16 }
   0xc   :  { %33 = dma.vmem_to_smem %s31_s20, 16, %s229_s25, [#allocation7]  }
   0xd   :  { %p178_p5 = scmp.ne.s32.totalorder %s21_s23, %s177_s26  ;;  %p182_p6 = scmp.lt.s32.totalorder %s21_s23, %s21_s23 }
   0xe   :  { %p183_p7 = scmp.lt.s32.totalorder %s177_s26, %s177_s26 }
  0x10   :  { %p184_p8 = por %p183_p7, %p182_p6 }
  0x12   :  { %p185_p9 = pnand %p184_p8, %p178_p5 }
  0x14   :  { %188 = shalt.err (!%p185_p9)
}
  0x15   :  { %s230_s1 = smov [#allocation3]   ;;  %s40_s28 = sshll.u32 %s325_s2, 4  ;;  %s41_s28 = int_to_ptr.vmem [resolvable:$true] %s40_s28 }
  0x16   :  { %23 = dma.vmem_to_smem %s21_s23, 16, %s230_s1, [#allocation5]  }
  0x17   :  { %s189_s29 = scalar_lea.vmem %s41_s28, 16  ;;  %p194_p11 = scmp.lt.s32.totalorder %s41_s28, %s41_s28 }
  0x18   :  { %p190_p10 = scmp.ne.s32.totalorder %s41_s28, %s189_s29  ;;  %p195_p12 = scmp.lt.s32.totalorder %s189_s29, %s189_s29 }
  0x1a   :  { %p196_p13 = por %p195_p12, %p194_p11 }
  0x1c   :  { %p197_p0 = pnand %p196_p13, %p190_p10 }
  0x1e   :  { %200 = shalt.err (!%p197_p0)
}
  0x1f   :  { %s231_s30 = smov [#allocation8]  }
  0x20   :  { %43 = dma.vmem_to_smem %s41_s28, 16, %s231_s30, [#allocation7]  }
  0x21   :  { %223 = dma.done.wait [#allocation5], 16  }
  0x22   :  { %224 = vsyncadd [#allocation5], 4294967280 }
  0x23   :  { %225 = dma.done.wait [#allocation7], 32  }
  0x24   :  { %226 = vsyncadd [#allocation7], 4294967264 }
  0x25   :  { %57 = sfence }
  0x26   :  { %s59_s6 = sld [smem:[#allocation3]]  ;;  %s146_s2 = sld [smem:[#allocation3 + $0x1]]  ;;  %v58_v0 = vld [vmem:[%s327_s4] sm:$0xff]  ;;  %v126_v47 = vstv %s326_s3 }
  0x27   :  { %s62_s7 = sld [smem:[#allocation6]]  ;;  %s147_s9 = sld [smem:[#allocation6 + $0x1]] }
  0x28   :  { %s272_s8 = sld [smem:[#allocation8]]  ;;  %s274_s10 = sld [smem:[#allocation8 + $0x1]] }
  0x29   :  { %s149_s11 = sld [smem:[#allocation3 + $0x2]]  ;;  %s152_s16 = sld [smem:[#allocation3 + $0x3]] }
  0x2a   :  { %s276_s12 = sld [smem:[#allocation6 + $0x2]]  ;;  %s283_s17 = sld [smem:[#allocation6 + $0x3]] }
  0x2b   :  { %s281_s15 = sld [smem:[#allocation8 + $0x2]]  ;;  %s285_s18 = sld [smem:[#allocation8 + $0x3]] }
  0x2c   :  { %v60_v1 = vstv %s59_s6  ;;  %s155_s19 = sld [smem:[#allocation3 + $0x4]]  ;;  %v71_v4 = vstv %s146_s2  ;;  %s289_s21 = sld [smem:[#allocation3 + $0x5]] }
  0x2d   :  { %v63_v2 = vstv %s62_s7  ;;  %s287_s20 = sld [smem:[#allocation6 + $0x4]]  ;;  %v61_v3 = vmul.f32 %v60_v1, %v58_v0  ;;  %v72_v5 = vmul.f32 %v71_v4, %v58_v0  ;;  %v74_v6 = vstv %s147_s9  ;;  %s293_s22 = sld [smem:[#allocation6 + $0x5]] }
  0x2e   :  { %s291_s4 = sld [smem:[#allocation8 + $0x4]]  ;;  %v67_v8 = vstv %s272_s8  ;;  %v78_v12 = vstv %s274_s10  ;;  %s298_s23 = sld [smem:[#allocation8 + $0x5]] }
  0x2f   :  { %v64_v7 = vadd.f32 %v63_v2, %v61_v3  ;;  %v82_v9 = vstv %s149_s11  ;;  %v75_v11 = vadd.f32 %v74_v6, %v72_v5  ;;  %v93_v14 = vstv %s152_s16  ;;  %s232_s26 = smov [#allocation9]  }
  0x30   :  { %v85_v10 = vstv %s276_s12  ;;  %v83_v13 = vmul.f32 %v82_v9, %v58_v0  ;;  %v94_v17 = vmul.f32 %v93_v14, %v58_v0  ;;  %v96_v18 = vstv %s283_s17  ;;  %s136_s1 = sshll.u32 %s232_s26, 4  ;;  %s137_s1 = int_to_ptr.vmem [resolvable:$true] %s136_s1 }
  0x31   :  { %v65_v15 = vmax.f32 %v64_v7, 0.0  ;;  %v89_v16 = vstv %s281_s15  ;;  %v76_v19 = vmax.f32 %v75_v11, 0.0  ;;  %v100_v25 = vstv %s285_s18  ;;  %s201_s0 = scalar_lea.vmem %s137_s1, 128  ;;  %p206_p2 = scmp.lt.s32.totalorder %s137_s1, %s137_s1 }
  0x32   :  { %v86_v20 = vadd.f32 %v85_v10, %v83_v13  ;;  %v104_v21 = vstv %s155_s19  ;;  %v97_v24 = vadd.f32 %v96_v18, %v94_v17  ;;  %v115_v29 = vstv %s289_s21  ;;  %p202_p1 = scmp.ne.s32.totalorder %s137_s1, %s201_s0  ;;  %p207_p3 = scmp.lt.s32.totalorder %s201_s0, %s201_s0 }
  0x33   :  { %v107_v22 = vstv %s287_s20  ;;  %v68_v23 = vmul.f32 %v67_v8, %v65_v15  ;;  %v105_v26 = vmul.f32 %v104_v21, %v58_v0  ;;  %v79_v27 = vmul.f32 %v78_v12, %v76_v19 }
  0x34   :  { %v87_v28 = vmax.f32 %v86_v20, 0.0  ;;  %v118_v30 = vstv %s293_s22  ;;  %v98_v31 = vmax.f32 %v97_v24, 0.0  ;;  %v116_v33 = vmul.f32 %v115_v29, %v58_v0  ;;  %p208_p4 = por %p207_p3, %p206_p2 }
  0x35   :  { %v108_v32 = vadd.f32 %v107_v22, %v105_v26  ;;  %v80_v34 = vadd.f32 %v79_v27, %v68_v23  ;;  %v111_v36 = vstv %s291_s4  ;;  %v122_v41 = vstv %s298_s23 }
  0x36   :  { %v90_v35 = vmul.f32 %v89_v16, %v87_v28  ;;  %v101_v37 = vmul.f32 %v100_v25, %v98_v31  ;;  %v119_v39 = vadd.f32 %v118_v30, %v116_v33  ;;  %p209_p5 = pnand %p208_p4, %p202_p1 }
  0x37   :  { %v109_v38 = vmax.f32 %v108_v32, 0.0 }
  0x38   :  { %v91_v40 = vadd.f32 %v90_v35, %v80_v34  ;;  %v120_v43 = vmax.f32 %v119_v39, 0.0 }
  0x39   :  { %v112_v42 = vmul.f32 %v111_v36, %v109_v38 }
  0x3a   :  { %v102_v44 = vadd.f32 %v101_v37, %v91_v40  ;;  %v123_v45 = vmul.f32 %v122_v41, %v120_v43 }
  0x3c   :  { %v113_v46 = vadd.f32 %v112_v42, %v102_v44 }
  0x3e   :  { %v124_v48 = vadd.f32 %v123_v45, %v113_v46 }
  0x40   :  { %v127_v49 = vadd.f32 %v126_v47, %v124_v48 }
  0x42   :  { %v128_v50 = vmax.f32 %v127_v49, 0.0 }
  0x44   :  { %129 = vst [vmem:[#allocation9] sm:$0xff] %v128_v50 }
  0x45   :  { %212 = shalt.err (!%p209_p5)
}
  0x46   :  { %s213_s29 = scalar_lea.hbm %s328_s5, 128 }
  0x47   :  { %p214_p6 = scmp.ne.s32.totalorder %s328_s5, %s213_s29  ;;  %p217_p7 = scmp.lt.u32.totalorder %s213_s29, %s328_s5 }
  0x49   :  { %p219_p8 = pnand %p217_p7, %p214_p6 }
  0x4b   :  { %222 = shalt.err (!%p219_p8)
}
  0x4c   :  { %139 = dma.vmem_to_hbm [thread:$0]  %s137_s1, 128, %s328_s5, [#allocation4]  }
  0x4d   :  { %227 = dma.done.wait [#allocation4], 128  }
  0x4e   :  { %228 = vsyncadd [#allocation4], 4294967168 }
  0x4f   :  { %143 = vsyncpa [#allocation4], 1 }
  0x50   :  { %144 = vsyncpa [#allocation5], 1 }
  0x51   :  { %145 = vsyncpa [#allocation7], 1 }

</bundles_post_ra>
